<compile_context>
chip_gen: v6e
topology: v6e:2x2x1
jax: 0.10.0
libtpu: 0.0.40
codegen_flags: <defaults>
</compile_context>

<pallas_src>
import jax
import jax.numpy as jnp
from jax import lax
from jax.experimental import pallas as pl
from jax.experimental.pallas import tpu as pltpu

LN_EPS = 1e-5  # PyTorch nn.LayerNorm default


# ----------------------------------------------------------------------------
# Kernels
# ----------------------------------------------------------------------------
def _ffn_kernel_resident(x_ref, w1_ref, b1_ref, w2_ref, b2_ref,
                         gamma_ref, beta_ref, o_ref):
    """Full d_ff resident in VMEM; one grid axis over row tiles."""
    x = x_ref[...]                                           # (rm, d_model), MXU dtype
    h = jnp.dot(x, w1_ref[...], preferred_element_type=jnp.float32)
    h = jnp.maximum(h + b1_ref[...], 0.0)                    # (rm, d_ff), f32
    y = jnp.dot(h.astype(w2_ref.dtype), w2_ref[...],
                preferred_element_type=jnp.float32)
    y = y + b2_ref[...]                                      # (rm, d_model), f32
    z = y + x.astype(jnp.float32)                            # residual
    mean = jnp.mean(z, axis=-1, keepdims=True)
    var = jnp.mean((z - mean) * (z - mean), axis=-1, keepdims=True)
    zn = (z - mean) * lax.rsqrt(var + LN_EPS)
    o_ref[...] = (zn * gamma_ref[...] + beta_ref[...]).astype(o_ref.dtype)


def _ffn_kernel_streamed(x_ref, w1_ref, b1_ref, w2_ref, b2_ref,
                         gamma_ref, beta_ref, o_ref, acc_ref):
    """d_ff tiled on the (last, 'arbitrary') grid axis; f32 accumulator."""
    k = pl.program_id(1)

    @pl.when(k == 0)
    def _init():
        acc_ref[...] = jnp.zeros_like(acc_ref)

    x = x_ref[...]                                           # already MXU dtype
    h = jnp.dot(x, w1_ref[...], preferred_element_type=jnp.float32)
    h = jnp.maximum(h + b1_ref[...], 0.0)                    # (rm, tf), f32
    acc_ref[...] += jnp.dot(h.astype(w2_ref.dtype), w2_ref[...],
                            preferred_element_type=jnp.float32)

    @pl.when(k == pl.num_programs(1) - 1)
    def _finalize():
        y = acc_ref[...] + b2_ref[...]
        z = y + x.astype(jnp.float32)                        # residual
        mean = jnp.mean(z, axis=-1, keepdims=True)
        var = jnp.mean((z - mean) * (z - mean), axis=-1, keepdims=True)
        zn = (z - mean) * lax.rsqrt(var + LN_EPS)
        o_ref[...] = (zn * gamma_ref[...] + beta_ref[...]).astype(o_ref.dtype)


# ----------------------------------------------------------------------------
# Wrapper
# ----------------------------------------------------------------------------
def _round_up(n, m):
    return ((n + m - 1) // m) * m


def _vmem_capacity_bytes():
    try:
        info = pltpu.get_tpu_info()
        cap = getattr(info, "vmem_capacity_bytes", None)
        if cap:
            return int(cap)
    except Exception:
        pass
    return 64 * 1024 * 1024  # conservative fallback (v7x per-TC)


def _largest_aligned_divisor(n, pref, align=128):
    """Largest multiple of `align` dividing n and <= pref; n itself if none."""
    if n % align != 0:
        # TODO(synk): for non-128-aligned d_ff, padding d_ff in the wrapper
        # would give lane-dense MXU tiles; fall back to full extent here.
        return n
    best = None
    t = align
    while t <= min(pref, n):
        if n % t == 0:
            best = t
        t += align
    return best if best is not None else n


def positionwise_feed_forward(x, w1, b1, w2, b2, gamma, beta, *,
                              row_tile=None, dff_tile=1024,
                              matmul_dtype=jnp.bfloat16, schedule=None):
    """x: [B, T, d_model] -> [B, T, d_model]."""
    B, T, d_model = x.shape
    d_ff = w1.shape[1]
    rows = B * T
    itm = jnp.dtype(matmul_dtype).itemsize
    ito = jnp.dtype(x.dtype).itemsize

    capacity = _vmem_capacity_bytes()
    vmem_cap = int(capacity * 0.85)  # headroom for Mosaic internal scratch

    # Row tile: capacity-aware default so arithmetic intensity sits above the
    # roofline knee even when streaming weights; clamped for small inputs and
    # always a multiple of 8 (sublanes).  Production shapes should keep
    # d_model a multiple of 128 for lane-dense stores.
    if row_tile is None:
        row_tile = 1024 if capacity >= (96 << 20) else 512
    rm = min(row_tile, _round_up(rows, 8))
    n_row_tiles = pl.cdiv(rows, rm)

    # Cast x to the MXU dtype once here (not per grid step in the kernel).
    # Residual picks up this rounding when matmul_dtype != x.dtype (inference).
    x2d = x.reshape(rows, d_model).astype(matmul_dtype)
    w1c = w1.astype(matmul_dtype)
    w2c = w2.astype(matmul_dtype)
    b1_2d = b1.reshape(1, d_ff).astype(jnp.float32)
    b2_2d = b2.reshape(1, d_model).astype(jnp.float32)
    gamma_2d = gamma.reshape(1, d_model).astype(jnp.float32)
    beta_2d = beta.reshape(1, d_model).astype(jnp.float32)

    param_bytes = (b1_2d.size + b2_2d.size + gamma_2d.size + beta_2d.size) * 4
    weight_bytes = (w1c.size + w2c.size) * itm

    # --- Schedule selection --------------------------------------------------
    # Resident: W1/W2 block indices are constant over the whole grid, so each
    # weight is DMA'd from HBM exactly once.  Streamed: re-streams weights per
    # row tile, only used when the resident footprint exceeds the VMEM budget.
    resident_est = (2 * weight_bytes              # W1 + W2 (pipelined buffers)
                    + 2 * param_bytes             # biases / LN params
                    + 2 * rm * d_model * itm      # x tile (double-buffered)
                    + 2 * rm * d_model * ito      # out tile (double-buffered)
                    + rm * d_ff * 4               # f32 'h' intermediate
                    + rm * d_model * 4)           # f32 z / LN temporaries
    if schedule is None or schedule == "auto":
        use_resident = resident_est <= vmem_cap
    elif schedule in ("resident", "streamed"):
        use_resident = schedule == "resident"
    else:
        raise ValueError(f"unknown schedule: {schedule!r}")

    if use_resident:
        grid = (n_row_tiles,)
        in_specs = [
            pl.BlockSpec((rm, d_model), lambda i: (i, 0)),      # x tile
            pl.BlockSpec((d_model, d_ff), lambda i: (0, 0)),    # W1 (resident)
            pl.BlockSpec((1, d_ff), lambda i: (0, 0)),          # b1
            pl.BlockSpec((d_ff, d_model), lambda i: (0, 0)),    # W2 (resident)
            pl.BlockSpec((1, d_model), lambda i: (0, 0)),       # b2
            pl.BlockSpec((1, d_model), lambda i: (0, 0)),       # gamma
            pl.BlockSpec((1, d_model), lambda i: (0, 0)),       # beta
        ]
        out_specs = pl.BlockSpec((rm, d_model), lambda i: (i, 0))
        scratch_shapes = []
        kernel = _ffn_kernel_resident
        # TODO(synk): on v7x, pltpu.CORE_PARALLEL (or an explicit core_map)
        # on this axis guarantees 2-TC sharding; "parallel" kept for
        # portability across generations.
        dim_sem = ("parallel",)
        vmem_est = resident_est
        weight_traffic = weight_bytes                           # once
    else:
        tf = _largest_aligned_divisor(d_ff, dff_tile)
        nk = d_ff // tf
        grid = (n_row_tiles, nk)
        in_specs = [
            pl.BlockSpec((rm, d_model), lambda i, k: (i, 0)),   # x tile (const over k)
            pl.BlockSpec((d_model, tf), lambda i, k: (0, k)),   # W1 tile
            pl.BlockSpec((1, tf), lambda i, k: (0, k)),         # b1 tile
            pl.BlockSpec((tf, d_model), lambda i, k: (k, 0)),   # W2 tile
            pl.BlockSpec((1, d_model), lambda i, k: (0, 0)),    # b2
            pl.BlockSpec((1, d_model), lambda i, k: (0, 0)),    # gamma
            pl.BlockSpec((1, d_model), lambda i, k: (0, 0)),    # beta
        ]
        out_specs = pl.BlockSpec((rm, d_model), lambda i, k: (i, 0))
        scratch_shapes = [pltpu.VMEM((rm, d_model), jnp.float32)]
        kernel = _ffn_kernel_streamed
        dim_sem = ("parallel", "arbitrary")
        vmem_est = (2 * (rm * d_model * itm           # x tile
                         + d_model * tf * itm         # W1 tile
                         + tf * 4                     # b1 tile
                         + tf * d_model * itm         # W2 tile
                         + rm * d_model * ito)        # out tile
                    + 2 * param_bytes
                    + rm * d_model * 4                # acc scratch
                    + rm * tf * 4)                    # f32 'h' intermediate
        weight_traffic = n_row_tiles * weight_bytes   # re-streamed per row tile
        # TODO(synk): if profiling shows exposed weight DMA (v7x, small rm),
        # add pipeline_mode=pl.Buffered(3) to the W1/W2 BlockSpecs.

    vmem_limit = int(min(vmem_cap, max(int(vmem_est * 1.25), 16 << 20)))

    cost = pl.CostEstimate(
        flops=int(4 * rows * d_model * d_ff),
        transcendentals=int(rows),
        bytes_accessed=int(x2d.size * itm + weight_traffic + param_bytes
                           + rows * d_model * ito))

    out2d = pl.pallas_call(
        kernel,
        out_shape=jax.ShapeDtypeStruct((rows, d_model), x.dtype),
        grid_spec=pltpu.PrefetchScalarGridSpec(
            num_scalar_prefetch=0,
            grid=grid,
            in_specs=in_specs,
            out_specs=out_specs,
            scratch_shapes=scratch_shapes,
        ),
        compiler_params=pltpu.CompilerParams(
            dimension_semantics=dim_sem,
            vmem_limit_bytes=vmem_limit),
        cost_estimate=cost,
    )(x2d, w1c, b1_2d, w2c, b2_2d, gamma_2d, beta_2d)

    return out2d.reshape(B, T, d_model)


# ----------------------------------------------------------------------------
# Reference + test
# ----------------------------------------------------------------------------
def _reference(x, w1, b1, w2, b2, gamma, beta):
    h = jnp.maximum(x @ w1 + b1, 0.0)
    y = h @ w2 + b2
    z = y + x
    mean = jnp.mean(z, axis=-1, keepdims=True)
    var = jnp.mean((z - mean) ** 2, axis=-1, keepdims=True)
    zn = (z - mean) / jnp.sqrt(var + LN_EPS)
    return zn * gamma + beta


if __name__ == "__main__":
    B, T, d_model, d_ff = 2, 8, 32, 256

    key = jax.random.PRNGKey(0)
    k_x, k_w1, k_b1, k_w2, k_b2 = jax.random.split(key, 5)

    x = jax.random.normal(k_x, (B, T, d_model), dtype=jnp.float32)

    # Deterministic parameter init (PyTorch Linear-style uniform bounds).
    bound1 = 1.0 / (d_model ** 0.5)
    bound2 = 1.0 / (d_ff ** 0.5)
    w1 = jax.random.uniform(k_w1, (d_model, d_ff), jnp.float32, -bound1, bound1)
    b1 = jax.random.uniform(k_b1, (d_ff,), jnp.float32, -bound1, bound1)
    w2 = jax.random.uniform(k_w2, (d_ff, d_model), jnp.float32, -bound2, bound2)
    b2 = jax.random.uniform(k_b2, (d_model,), jnp.float32, -bound2, bound2)
    gamma = jnp.ones((d_model,), jnp.float32)   # LayerNorm weight init
    beta = jnp.zeros((d_model,), jnp.float32)   # LayerNorm bias init

    ref = _reference(x, w1, b1, w2, b2, gamma, beta)

    # 1) Resident-weight path, f32 MXU: tight check against the f32 reference.
    out_f32 = positionwise_feed_forward(x, w1, b1, w2, b2, gamma, beta,
                                        matmul_dtype=jnp.float32)
    out_f32 = jax.block_until_ready(out_f32)
    assert out_f32.shape == (B, T, d_model)
    assert jnp.allclose(out_f32, ref, atol=1e-4, rtol=1e-4)

    # 2) Production default: resident weights, bf16 MXU inputs, f32 accumulate.
    out_bf16 = positionwise_feed_forward(x, w1, b1, w2, b2, gamma, beta)
    out_bf16 = jax.block_until_ready(out_bf16)
    assert out_bf16.shape == (B, T, d_model)
    assert jnp.allclose(out_bf16, ref, atol=4e-2, rtol=4e-2)

    # 3) Streamed path (forced) with real d_ff accumulation (nk=2), f32 MXU.
    out_stream = positionwise_feed_forward(x, w1, b1, w2, b2, gamma, beta,
                                           matmul_dtype=jnp.float32,
                                           dff_tile=128, schedule="streamed")
    out_stream = jax.block_until_ready(out_stream)
    assert out_stream.shape == (B, T, d_model)
    assert jnp.allclose(out_stream, ref, atol=1e-4, rtol=1e-4)

    print("KERNEL_OK")
</pallas_src>

<mosaic_0001>
module attributes {stable_mosaic.version = 11 : i64} {
  func.func @_ffn_kernel_resident(%arg0: i32, %arg1: memref<16x32xf32, #tpu.memory_space<vmem>>, %arg2: memref<32x256xf32, #tpu.memory_space<vmem>>, %arg3: memref<1x256xf32, #tpu.memory_space<vmem>>, %arg4: memref<256x32xf32, #tpu.memory_space<vmem>>, %arg5: memref<1x32xf32, #tpu.memory_space<vmem>>, %arg6: memref<1x32xf32, #tpu.memory_space<vmem>>, %arg7: memref<1x32xf32, #tpu.memory_space<vmem>>, %arg8: memref<16x32xf32, #tpu.memory_space<vmem>>) attributes {dimension_semantics = [#tpu.dimension_semantics<parallel>], iteration_bounds = array<i64: 1>, scalar_prefetch = 0 : i64, scratch_operands = 0 : i64, tpu.core_type = #tpu.core_type<tc>, window_params = [{transform_indices = @transform_0, window_bounds = array<i64: 16, 32>}, {pipeline_mode = #tpu.pipeline_mode<synchronous>, transform_indices = @transform_1, window_bounds = array<i64: 32, 256>}, {pipeline_mode = #tpu.pipeline_mode<synchronous>, transform_indices = @transform_2, window_bounds = array<i64: 1, 256>}, {pipeline_mode = #tpu.pipeline_mode<synchronous>, transform_indices = @transform_3, window_bounds = array<i64: 256, 32>}, {pipeline_mode = #tpu.pipeline_mode<synchronous>, transform_indices = @transform_4, window_bounds = array<i64: 1, 32>}, {pipeline_mode = #tpu.pipeline_mode<synchronous>, transform_indices = @transform_5, window_bounds = array<i64: 1, 32>}, {pipeline_mode = #tpu.pipeline_mode<synchronous>, transform_indices = @transform_6, window_bounds = array<i64: 1, 32>}, {transform_indices = @transform_7, window_bounds = array<i64: 16, 32>}]} {
    %c0 = arith.constant 0 : index
    %c0_0 = arith.constant 0 : index
    %0 = vector.load %arg1[%c0, %c0_0] : memref<16x32xf32, #tpu.memory_space<vmem>>, vector<16x32xf32>
    %c0_1 = arith.constant 0 : index
    %c0_2 = arith.constant 0 : index
    %1 = vector.load %arg2[%c0_1, %c0_2] : memref<32x256xf32, #tpu.memory_space<vmem>>, vector<32x256xf32>
    %cst = arith.constant dense<0.000000e+00> : vector<16x256xf32>
    %2 = tpu.matmul %0, %1, %cst {dimension_numbers = #tpu.dot_dimension_numbers<[1], [0], [0], [1], [0, 0, 1, 1], [], []>} : vector<16x32xf32>, vector<32x256xf32>, vector<16x256xf32> -> vector<16x256xf32>
    %c0_3 = arith.constant 0 : index
    %c0_4 = arith.constant 0 : index
    %3 = vector.load %arg3[%c0_3, %c0_4] : memref<1x256xf32, #tpu.memory_space<vmem>>, vector<1x256xf32>
    %4 = vector.broadcast %3 : vector<1x256xf32> to vector<16x256xf32>
    %5 = arith.addf %2, %4 : vector<16x256xf32>
    %cst_5 = arith.constant 0.000000e+00 : f32
    %6 = vector.broadcast %cst_5 : f32 to vector<16x256xf32>
    %7 = arith.maximumf %5, %6 : vector<16x256xf32>
    %c0_6 = arith.constant 0 : index
    %c0_7 = arith.constant 0 : index
    %8 = vector.load %arg4[%c0_6, %c0_7] : memref<256x32xf32, #tpu.memory_space<vmem>>, vector<256x32xf32>
    %cst_8 = arith.constant dense<0.000000e+00> : vector<16x32xf32>
    %9 = tpu.matmul %7, %8, %cst_8 {dimension_numbers = #tpu.dot_dimension_numbers<[1], [0], [0], [1], [0, 0, 1, 1], [], []>} : vector<16x256xf32>, vector<256x32xf32>, vector<16x32xf32> -> vector<16x32xf32>
    %c0_9 = arith.constant 0 : index
    %c0_10 = arith.constant 0 : index
    %10 = vector.load %arg5[%c0_9, %c0_10] : memref<1x32xf32, #tpu.memory_space<vmem>>, vector<1x32xf32>
    %11 = vector.broadcast %10 : vector<1x32xf32> to vector<16x32xf32>
    %12 = arith.addf %9, %11 : vector<16x32xf32>
    %13 = arith.addf %12, %0 : vector<16x32xf32>
    %cst_11 = arith.constant dense<0.000000e+00> : vector<16xf32>
    %14 = vector.multi_reduction <add>, %13, %cst_11 [1] : vector<16x32xf32> to vector<16xf32>
    %15 = vector.shape_cast %14 : vector<16xf32> to vector<16x1xf32>
    %cst_12 = arith.constant 3.200000e+01 : f32
    %16 = vector.broadcast %cst_12 : f32 to vector<16x1xf32>
    %17 = arith.divf %15, %16 : vector<16x1xf32>
    %18 = vector.broadcast %17 : vector<16x1xf32> to vector<16x32xf32>
    %19 = arith.subf %13, %18 : vector<16x32xf32>
    %20 = vector.broadcast %17 : vector<16x1xf32> to vector<16x32xf32>
    %21 = arith.subf %13, %20 : vector<16x32xf32>
    %22 = arith.mulf %19, %21 : vector<16x32xf32>
    %cst_13 = arith.constant dense<0.000000e+00> : vector<16xf32>
    %23 = vector.multi_reduction <add>, %22, %cst_13 [1] : vector<16x32xf32> to vector<16xf32>
    %24 = vector.shape_cast %23 : vector<16xf32> to vector<16x1xf32>
    %cst_14 = arith.constant 3.200000e+01 : f32
    %25 = vector.broadcast %cst_14 : f32 to vector<16x1xf32>
    %26 = arith.divf %24, %25 : vector<16x1xf32>
    %27 = vector.broadcast %17 : vector<16x1xf32> to vector<16x32xf32>
    %28 = arith.subf %13, %27 : vector<16x32xf32>
    %cst_15 = arith.constant 9.99999974E-6 : f32
    %29 = vector.broadcast %cst_15 : f32 to vector<16x1xf32>
    %30 = arith.addf %26, %29 : vector<16x1xf32>
    %31 = math.rsqrt %30 : vector<16x1xf32>
    %32 = vector.broadcast %31 : vector<16x1xf32> to vector<16x32xf32>
    %33 = arith.mulf %28, %32 : vector<16x32xf32>
    %c0_16 = arith.constant 0 : index
    %c0_17 = arith.constant 0 : index
    %34 = vector.load %arg6[%c0_16, %c0_17] : memref<1x32xf32, #tpu.memory_space<vmem>>, vector<1x32xf32>
    %35 = vector.broadcast %34 : vector<1x32xf32> to vector<16x32xf32>
    %36 = arith.mulf %33, %35 : vector<16x32xf32>
    %c0_18 = arith.constant 0 : index
    %c0_19 = arith.constant 0 : index
    %37 = vector.load %arg7[%c0_18, %c0_19] : memref<1x32xf32, #tpu.memory_space<vmem>>, vector<1x32xf32>
    %38 = vector.broadcast %37 : vector<1x32xf32> to vector<16x32xf32>
    %39 = arith.addf %36, %38 : vector<16x32xf32>
    %c0_20 = arith.constant 0 : index
    %c0_21 = arith.constant 0 : index
    %40 = vector.load %arg8[%c0_20, %c0_21] : memref<16x32xf32, #tpu.memory_space<vmem>>, vector<16x32xf32>
    tpu.vector_store %arg8[%c0_20, %c0_21], %39 {strides = array<i32>} : memref<16x32xf32, #tpu.memory_space<vmem>>, vector<16x32xf32>,
    return
  }
  func.func @transform_0(%arg0: i32) -> (i32, i32) {
    %c0_i32 = arith.constant 0 : i32
    %c0_i32_0 = arith.constant 0 : i32
    return %arg0, %c0_i32 : i32, i32
  }
  func.func @transform_1(%arg0: i32) -> (i32, i32) {
    %c0_i32 = arith.constant 0 : i32
    %c0_i32_0 = arith.constant 0 : i32
    %c0_i32_1 = arith.constant 0 : i32
    return %c0_i32, %c0_i32_0 : i32, i32
  }
  func.func @transform_2(%arg0: i32) -> (i32, i32) {
    %c0_i32 = arith.constant 0 : i32
    %c0_i32_0 = arith.constant 0 : i32
    %c0_i32_1 = arith.constant 0 : i32
    return %c0_i32, %c0_i32_0 : i32, i32
  }
  func.func @transform_3(%arg0: i32) -> (i32, i32) {
    %c0_i32 = arith.constant 0 : i32
    %c0_i32_0 = arith.constant 0 : i32
    %c0_i32_1 = arith.constant 0 : i32
    return %c0_i32, %c0_i32_0 : i32, i32
  }
  func.func @transform_4(%arg0: i32) -> (i32, i32) {
    %c0_i32 = arith.constant 0 : i32
    %c0_i32_0 = arith.constant 0 : i32
    %c0_i32_1 = arith.constant 0 : i32
    return %c0_i32, %c0_i32_0 : i32, i32
  }
  func.func @transform_5(%arg0: i32) -> (i32, i32) {
    %c0_i32 = arith.constant 0 : i32
    %c0_i32_0 = arith.constant 0 : i32
    %c0_i32_1 = arith.constant 0 : i32
    return %c0_i32, %c0_i32_0 : i32, i32
  }
  func.func @transform_6(%arg0: i32) -> (i32, i32) {
    %c0_i32 = arith.constant 0 : i32
    %c0_i32_0 = arith.constant 0 : i32
    %c0_i32_1 = arith.constant 0 : i32
    return %c0_i32, %c0_i32_0 : i32, i32
  }
  func.func @transform_7(%arg0: i32) -> (i32, i32) {
    %c0_i32 = arith.constant 0 : i32
    %c0_i32_0 = arith.constant 0 : i32
    return %arg0, %c0_i32 : i32, i32
  }
}

</mosaic_0001>

<bundles_post_ra>
// kernel: tpu_custom_call.1
= control target key start
LH: loop header
LB: loop body
LE: loop exit
PB: predicated region body
PF: predicated region fallthrough
CT: control target
= control target key end

     0   :  { %v389_v4 = vmov 0.0   ;;  %vm49_vm0 = vcmask 261120   ;;  %s590_s0 = inlined_call_operand.vmem [shape: f32[16,32], index: 0, kind: input, shape index: {}]   ;;  %s591_s1 = inlined_call_operand.vmem [shape: f32[32,256], index: 1, kind: input, shape index: {}]   ;;  %s592_s2 = inlined_call_operand.vmem [shape: f32[1,256], index: 2, kind: input, shape index: {}]   ;;  %s593_s3 = inlined_call_operand.vmem [shape: f32[256,32], index: 3, kind: input, shape index: {}]   ;;  %s594_s4 = inlined_call_operand.vmem [shape: f32[1,32], index: 4, kind: input, shape index: {}]   ;;  %s595_s5 = inlined_call_operand.vmem [shape: f32[1,32], index: 5, kind: input, shape index: {}]   ;;  %s596_s6 = inlined_call_operand.vmem [shape: f32[1,32], index: 6, kind: input, shape index: {}]   ;;  %s597_s7 = inlined_call_operand.hbm [shape: f32[16,32], index: 7, kind: output, shape index: {}]  }
   0x1   :  { %v36_v0 = vld [vmem:[%s591_s1 + $0x38] sm:$0xff]  ;;  %v35_v1 = vld [vmem:[%s591_s1 + $0x30] sm:$0xff]  ;;  %v34_v2 = vld [vmem:[%s591_s1 + $0x28] sm:$0xff]  ;;  %120 = vmatprep.mubr.f32.mxu0 %v389_v4 }
   0x2   :  { %80 = vmatprep.subr.mxu0 %v36_v0  ;;  %v33_v3 = vld [vmem:[%s591_s1 + $0x20] sm:$0xff]  ;;  %v32_v5 = vld [vmem:[%s591_s1 + $0x18] sm:$0xff]  ;;  %v31_v6 = vld [vmem:[%s591_s1 + $0x10] sm:$0xff] }
   0x3   :  { %81 = vmatpush1.msra.mxu0 %v35_v1  ;;  %v168_v7 = vld [vmem:[%s593_s3 + $0xf8] sm:$0xff]  ;;  %v30_v9 = vld [vmem:[%s591_s1 + $0x8] sm:$0xff]  ;;  %v167_v10 = vld [vmem:[%s593_s3 + $0xf0] sm:$0xff] }
   0x4   :  { %82 = vmatprep.subr.mxu0 %v34_v2  ;;  %v152_v8 = vld [vmem:[%s593_s3 + $0x78] sm:$0xff]  ;;  %321 = vmatprep.subr.mxu1 %v168_v7  ;;  %v151_v11 = vld [vmem:[%s593_s3 + $0x70] sm:$0xff]  ;;  %v29_v12 = vld [vmem:[%s591_s1] sm:$0xff] }
   0x5   :  { %83 = vmatpush1.msra.mxu0 %v33_v3  ;;  %322 = vmatpush3.msra.mxu1 %v152_v8  ;;  %v166_v13 = vld [vmem:[%s593_s3 + $0xe8] sm:$0xff]  ;;  %v475_v14 = vld [vmem:[%s590_s0] sm:$0xff]  ;;  %v164_v18 = vld [vmem:[%s593_s3 + $0xd8] sm:$0xff] }
   0x6   :  { %84 = vmatprep.subr.mxu0 %v32_v5  ;;  %323 = vmatprep.subr.mxu1 %v167_v10  ;;  %v150_v15 = vld [vmem:[%s593_s3 + $0x68] sm:$0xff]  ;;  %v165_v16 = vld [vmem:[%s593_s3 + $0xe0] sm:$0xff]  ;;  %v148_v20 = vld [vmem:[%s593_s3 + $0x58] sm:$0xff] }
   0x7   :  { %85 = vmatpush1.msra.mxu0 %v31_v6  ;;  %324 = vmatpush3.msra.mxu1 %v151_v11  ;;  %v149_v17 = vld [vmem:[%s593_s3 + $0x60] sm:$0xff]  ;;  %v494_v19 = vld [vmem:[%s590_s0 + $0x8] sm:$0xff]  ;;  %v163_v21 = vld [vmem:[%s593_s3 + $0xd0] sm:$0xff] }
   0x8   :  { %86 = vmatprep.subr.mxu0 %v30_v9  ;;  %325 = vmatprep.subr.mxu1 %v166_v13 }
   0x9   :  { %87 = vmatpush1.msra.mxu0 %v29_v12  ;;  %326 = vmatpush3.msra.mxu1 %v150_v15 }
   0xa   :  { %316 = vmatmul.mubr.msk.f32.vlgmr.msra.gmra.mxu0 %vm49_vm0, %v475_v14  ;;  %327 = vmatprep.subr.mxu1 %v165_v16 }
   0xb   :  { %126 = vmatprep.mubr.f32.mxu0 %v389_v4  ;;  %328 = vmatpush3.msra.mxu1 %v149_v17 }
   0xc   :  { %12 = vsyncpa [#allocation3], 0  ;;  %329 = vmatprep.subr.mxu1 %v164_v18  ;;  %v147_v22 = vld [vmem:[%s593_s3 + $0x50] sm:$0xff]  ;;  %v162_v23 = vld [vmem:[%s593_s3 + $0xc8] sm:$0xff]  ;;  %v39_v43 = vlaneseq  ;;  %s390_s16 = smov [#allocation2]  }
   0xd   :  { %330 = vmatpush3.msra.mxu1 %v148_v20  ;;  %v146_v24 = vld [vmem:[%s593_s3 + $0x48] sm:$0xff]  ;;  %v161_v25 = vld [vmem:[%s593_s3 + $0xc0] sm:$0xff]  ;;  %v160_v27 = vld [vmem:[%s593_s3 + $0xb8] sm:$0xff]  ;;  %s305_s17 = sshll.u32 %s390_s16, 4  ;;  %s306_s17 = int_to_ptr.vmem [resolvable:$true] %s305_s17 }
   0xe   :  { %317 = vmatmul.mubr.msk.f32.gmra.mxu0 %vm49_vm0, %v494_v19  ;;  %331 = vmatprep.subr.mxu1 %v163_v21  ;;  %v145_v26 = vld [vmem:[%s593_s3 + $0x40] sm:$0xff]  ;;  %v144_v28 = vld [vmem:[%s593_s3 + $0x38] sm:$0xff]  ;;  %v159_v29 = vld [vmem:[%s593_s3 + $0xb0] sm:$0xff]  ;;  %v40_v44 = vshrl.u32 %v39_v43, 7  ;;  %s367_s18 = scalar_lea.vmem %s306_s17, 256  ;;  %p372_p1 = scmp.lt.s32.totalorder %s306_s17, %s306_s17 }
   0xf   :  { %332 = vmatpush3.msra.mxu1 %v147_v22  ;;  %v143_v30 = vld [vmem:[%s593_s3 + $0x30] sm:$0xff]  ;;  %v158_v31 = vld [vmem:[%s593_s3 + $0xa8] sm:$0xff]  ;;  %v157_v33 = vld [vmem:[%s593_s3 + $0xa0] sm:$0xff]  ;;  %p368_p0 = scmp.ne.s32.totalorder %s306_s17, %s367_s18  ;;  %p373_p2 = scmp.lt.s32.totalorder %s367_s18, %s367_s18 }
  0x10   :  { %333 = vmatprep.subr.mxu1 %v162_v23  ;;  %v142_v32 = vld [vmem:[%s593_s3 + $0x28] sm:$0xff]  ;;  %v141_v34 = vld [vmem:[%s593_s3 + $0x20] sm:$0xff]  ;;  %v156_v35 = vld [vmem:[%s593_s3 + $0x98] sm:$0xff]  ;;  %v41_v45 = vsub.s32 0, %v40_v44  ;;  %v45_v47 = vsub.s32 1, %v40_v44 }
  0x11   :  { %334 = vmatpush3.msra.mxu1 %v146_v24  ;;  %v140_v36 = vld [vmem:[%s593_s3 + $0x18] sm:$0xff]  ;;  %v155_v37 = vld [vmem:[%s593_s3 + $0x90] sm:$0xff]  ;;  %v154_v39 = vld [vmem:[%s593_s3 + $0x88] sm:$0xff]  ;;  %p374_p3 = por %p373_p2, %p372_p1 }
  0x12   :  { %335 = vmatprep.subr.mxu1 %v161_v25  ;;  %v139_v38 = vld [vmem:[%s593_s3 + $0x10] sm:$0xff]  ;;  %v138_v40 = vld [vmem:[%s593_s3 + $0x8] sm:$0xff]  ;;  %v153_v41 = vld [vmem:[%s593_s3 + $0x80] sm:$0xff] }
  0x13   :  { %336 = vmatpush3.msra.mxu1 %v145_v26  ;;  %v137_v42 = vld [vmem:[%s593_s3] sm:$0xff]  ;;  %p375_p4 = pnand %p374_p3, %p368_p0 }
  0x14   :  { %337 = vmatprep.subr.mxu1 %v160_v27  ;;  %v37_v46 = vld [vmem:[%s592_s2] sm:$0x3] }
  0x15   :  { %338 = vmatpush3.msra.mxu1 %v144_v28  ;;  %v42_v48 = vrot.slane %v37_v46, %v41_v45  ;;  %v46_v49 = vrot.slane %v37_v46, %v45_v47  ;;  %v318_v63 = vld [vmem:[%s594_s4] ss:$0 sm:$0xff] }
  0x16   :  { %339 = vmatprep.subr.mxu1 %v159_v29  ;;  %v319_v28 = vld [vmem:[%s595_s5] ss:$0 sm:$0xff] }
  0x17   :  { %340 = vmatpush3.msra.mxu1 %v143_v30  ;;  %v320_v30 = vld [vmem:[%s596_s6] ss:$0 sm:$0xff] }
  0x18   :  { %341 = vmatprep.subr.mxu1 %v158_v31 }
  0x19   :  { %342 = vmatpush3.msra.mxu1 %v142_v32 }
  0x1a   :  { %343 = vmatprep.subr.mxu1 %v157_v33 }
  0x1b   :  { %344 = vmatpush3.msra.mxu1 %v141_v34 }
  0x1c   :  { %345 = vmatprep.subr.mxu1 %v156_v35 }
  0x1d   :  { %346 = vmatpush3.msra.mxu1 %v140_v36 }
  0x1e   :  { %347 = vmatprep.subr.mxu1 %v155_v37 }
  0x1f   :  { %348 = vmatpush3.msra.mxu1 %v139_v38 }
  0x20   :  { %349 = vmatprep.subr.mxu1 %v154_v39 }
  0x21   :  { %350 = vmatpush3.msra.mxu1 %v138_v40 }
  0x22   :  { %351 = vmatprep.subr.mxu1 %v153_v41 }
  0x23   :  { %352 = vmatpush3.msra.mxu1 %v137_v42 }
  0xca   :  { %v122_v50 = vpop.f32.mrf.mxu0 }
  0xcb   :  { %v123_v51 = vadd.f32 %v122_v50, %v42_v48 }
  0xcc   :  { %v124_v52 = vpop.f32.mrf.mxu0 }
  0xcd   :  { %v125_v53 = vadd.f32 %v124_v52, %v46_v49  ;;  %v133_v56 = vmax.f32 %v123_v51, 0.0 }
  0xce   :  { %v128_v54 = vpop.f32.mrf.mxu0 }
  0xcf   :  { %v134_v55 = vmax.f32 %v125_v53, 0.0  ;;  %v129_v57 = vadd.f32 %v128_v54, %v42_v48 }
  0xd0   :  { %v130_v58 = vpop.f32.mrf.mxu0 }
  0xd1   :  { %v131_v59 = vadd.f32 %v130_v58, %v46_v49  ;;  %240 = vmatprep.mubr.f32.mxu1 %v134_v55  ;;  %v135_v61 = vmax.f32 %v129_v57, 0.0 }
  0xd2   :  { %241 = vmatmul.mubr.f32.vlgmr.msra.gmra.mxu1 %v133_v56 }
  0xd3   :  { %v136_v60 = vmax.f32 %v131_v59, 0.0 }
  0xd5   :  { %245 = vmatprep.mubr.f32.mxu1 %v136_v60 }
  0xd6   :  { %246 = vmatmul.mubr.f32.gmra.mxu1 %v135_v61 }
 0x192   :  { %v353_v62 = vpop.f32.mrf.mxu1 }
 0x194   :  { %v354_v0 = vpop.f32.mrf.mxu1 }
 0x195   :  { %v355_v1 = vadd.f32 %v354_v0, %v353_v62 }
 0x196   :  { %v356_v2 = vpop.f32.mrf.mxu1 }
 0x197   :  { %v243_v3 = vadd.f32 %v355_v1, %v318_v63 }
 0x198   :  { %v357_v4 = vpop.f32.mrf.mxu1 }
 0x199   :  { %v358_v5 = vadd.f32 %v357_v4, %v356_v2  ;;  %v251_v6 = vadd.f32 %v243_v3, %v475_v14 }
 0x19b   :  { %v248_v7 = vadd.f32 %v358_v5, %v318_v63  ;;  %v253_v8 = vsel %vm49_vm0, %v251_v6, 0.0 }
 0x19c   :  { %254 = vadd.xlane.f32.xlu0 %v253_v8 }
 0x19d   :  { %v252_v9 = vadd.f32 %v248_v7, %v494_v19 }
 0x19f   :  { %v256_v10 = vsel %vm49_vm0, %v252_v9, 0.0 }
 0x1a0   :  { %257 = vadd.xlane.f32.xlu0 %v256_v10 }
 0x225   :  { %v255_v11 = vpop.xlane.xlu0 %254 }
 0x226   :  { %v260_v12 = vmul.f32 0.03125, %v255_v11 }
 0x228   :  { %v262_v13 = vsub.f32 %v251_v6, %v260_v12 }
 0x229   :  { %v258_v15 = vpop.xlane.xlu0 %257 }
 0x22a   :  { %v261_v16 = vmul.f32 0.03125, %v258_v15  ;;  %v264_v17 = vmul.f32 %v262_v13, %v262_v13 }
 0x22c   :  { %v263_v18 = vsub.f32 %v252_v9, %v261_v16  ;;  %v266_v20 = vsel %vm49_vm0, %v264_v17, 0.0 }
 0x22d   :  { %267 = vadd.xlane.f32.xlu1 %v266_v20 }
 0x22e   :  { %v265_v14 = vmul.f32 %v263_v18, %v263_v18 }
 0x230   :  { %v269_v21 = vsel %vm49_vm0, %v265_v14, 0.0 }
 0x231   :  { %270 = vadd.xlane.f32.xlu1 %v269_v21 }
 0x2b6   :  { %v268_v22 = vpop.xlane.xlu1 %267 }
 0x2b7   :  { %v272_v23 = vmul.f32 0.03125, %v268_v22 }
 0x2b9   :  { %v274_v19 = vadd.f32 1e-05, %v272_v23 }
 0x2ba   :  { %v271_v24 = vpop.xlane.xlu1 %270 }
 0x2bb   :  { %363 = vrsqrt.f32 %v274_v19  ;;  %v273_v25 = vmul.f32 0.03125, %v271_v24 }
 0x2bd   :  { %v275_v26 = vadd.f32 1e-05, %v273_v25 }
 0x2bf   :  { %365 = vrsqrt.f32 %v275_v26 }
 0x2c8   :  { %v364_v27 = vpop.eup %363 }
 0x2c9   :  { %v278_v29 = vmul.f32 %v364_v27, %v262_v13 }
 0x2cb   :  { %v287_v31 = vmul.f32 %v319_v28, %v278_v29 }
 0x2cc   :  { %v366_v32 = vpop.eup %365 }
 0x2cd   :  { %v279_v33 = vmul.f32 %v366_v32, %v263_v18  ;;  %v296_v34 = vadd.f32 %v320_v30, %v287_v31 }
 0x2cf   :  { %v288_v35 = vmul.f32 %v319_v28, %v279_v33  ;;  %298 = vst.msk [vmem:[#allocation2] sm:$0xff] %vm49_vm0, %v296_v34 }
 0x2d1   :  { %v297_v36 = vadd.f32 %v320_v30, %v288_v35 }
 0x2d3   :  { %299 = vst.msk [vmem:[#allocation2 + $0x8] sm:$0xff] %vm49_vm0, %v297_v36 }
 0x2d4   :  { %378 = shalt.err (!%p375_p4)
}
 0x2d5   :  { %s391_s5 = smov 128   ;;  %s392_s6 = smov 8  }
 0x2d6   :  { %311 = dma.vmem_to_hbm [thread:$0]  %s306_s17, 256, %s597_s7, [#allocation3], %s391_s5, %s391_s5, %s392_s6  }
 0x2d7   :  { %387 = dma.done.wait [#allocation3], 256  }
 0x2d8   :  { %388 = vsyncadd [#allocation3], 4294967040 }
 0x2d9   :  { %315 = vsyncpa [#allocation3], 1 }

</bundles_post_ra>
